<compile_context>
chip_gen: v7x
topology: tpu7x:2x2x1
jax: 0.10.0
libtpu: 0.0.40
codegen_flags: <defaults>
</compile_context>

<pallas_src>
import jax
import jax.numpy as jnp
import numpy as np
from jax.experimental import pallas as pl
from jax.experimental.pallas import tpu as pltpu


def _round_up(x, m):
    return (x + m - 1) // m * m


# --------------------------------------------------------------------------
# Generic (M,K)x(K,N)+bias matmul kernel, tiled over M only (K, N stay whole).
# Used for the hoisted input projection (N = 4*Hp, lane-dense output).
# --------------------------------------------------------------------------
def _matmul_bias_kernel(x_ref, w_ref, b_ref, o_ref):
    o_ref[...] = (jnp.dot(x_ref[...], w_ref[...],
                          preferred_element_type=jnp.float32)
                  + b_ref[...]).astype(o_ref.dtype)


def _matmul_bias(x2d, w, b2d, *, tm=256):
    M, K = x2d.shape
    N = w.shape[1]
    tm = min(tm, M)
    Mp = _round_up(M, tm)
    if Mp != M:
        x2d = jnp.pad(x2d, ((0, Mp - M), (0, 0)))
    out = pl.pallas_call(
        _matmul_bias_kernel,
        out_shape=jax.ShapeDtypeStruct((Mp, N), jnp.float32),
        grid_spec=pltpu.PrefetchScalarGridSpec(
            num_scalar_prefetch=0,
            grid=(Mp // tm,),
            in_specs=[
                pl.BlockSpec((tm, K), lambda i: (i, 0)),
                pl.BlockSpec((K, N), lambda i: (0, 0)),
                pl.BlockSpec((1, N), lambda i: (0, 0)),
            ],
            out_specs=pl.BlockSpec((tm, N), lambda i: (i, 0)),
        ),
        compiler_params=pltpu.CompilerParams(
            dimension_semantics=("parallel",)),
    )(x2d, w, b2d)
    return out[:M]


# --------------------------------------------------------------------------
# Sequential LSTM recurrence fused with the output Linear.
# Consumes precomputed x-projection gates, keeps (h, c) in VMEM scratch across
# grid steps, emits y_t = fc(h_t) for every timestep (lane-dense Op columns).
# --------------------------------------------------------------------------
def _lstm_fused_kernel(gx_ref, whh_ref, wfc_ref, bfc_ref, y_ref, h_sc, c_sc):
    @pl.when(pl.program_id(1) == 0)            # start of each sequence
    def _():
        h_sc[...] = jnp.zeros_like(h_sc)
        c_sc[...] = jnp.zeros_like(c_sc)

    tb = gx_ref.shape[0]                       # timesteps per grid block
    bb, hp = h_sc.shape                        # padded batch block / hidden
    op = y_ref.shape[-1]                       # padded output width (128-mult)

    # Hoist the fc-bias broadcast out of the time loop (no CSE on broadcasts).
    bfc = jnp.broadcast_to(bfc_ref[...], (bb, op))

    def step(s, carry):
        # Single MXU push for the recurrence: the x projection was hoisted.
        gates = gx_ref[s] + jnp.dot(h_sc[...], whh_ref[...],
                                    preferred_element_type=jnp.float32)
        # Gate slices land on 128-lane boundaries (hp % 128 == 0).
        i_g = jax.nn.sigmoid(gates[:, 0 * hp:1 * hp])
        f_g = jax.nn.sigmoid(gates[:, 1 * hp:2 * hp])
        g_g = jnp.tanh(gates[:, 2 * hp:3 * hp])
        o_g = jax.nn.sigmoid(gates[:, 3 * hp:4 * hp])
        c_new = f_g * c_sc[...] + i_g * g_g
        h_new = o_g * jnp.tanh(c_new)
        c_sc[...] = c_new
        h_sc[...] = h_new
        # Fused final Linear: one small MXU push, lane-dense (bb, op) store;
        # avoids writing/re-reading the full hidden sequence through HBM.
        y_ref[s] = (jnp.dot(h_new, wfc_ref[...],
                            preferred_element_type=jnp.float32)
                    + bfc).astype(y_ref.dtype)
        return carry

    jax.lax.fori_loop(0, tb, step, 0, unroll=True)


# --------------------------------------------------------------------------
# Wrapper: layout/padding glue + the two phases.
# --------------------------------------------------------------------------
def lstm_regressor_forward(x, params, *, time_block=8):
    """x: (B, T, I) float32. Returns (B, T, O) float32."""
    B, T, I = x.shape
    w_ih = jnp.asarray(params["w_ih"], jnp.float32)     # (4H, I)
    w_hh = jnp.asarray(params["w_hh"], jnp.float32)     # (4H, H)
    b_ih = jnp.asarray(params["b_ih"], jnp.float32)     # (4H,)
    b_hh = jnp.asarray(params["b_hh"], jnp.float32)     # (4H,)
    w_fc = jnp.asarray(params["w_fc"], jnp.float32)     # (O, H)
    b_fc = jnp.asarray(params["b_fc"], jnp.float32)     # (O,)
    H = w_hh.shape[1]
    O = w_fc.shape[0]

    # Padded sizes: each gate occupies a whole multiple-of-128 lane tile,
    # the fc output is padded to a 128-lane tile (unmasked stores), batch is
    # padded to the 8-sublane granularity and blocked for megacore.
    Hp = _round_up(H, 128)
    Op = _round_up(O, 128)
    Bp = _round_up(B, 8)
    B_BLK = min(Bp, 128)
    Bp = _round_up(Bp, B_BLK)
    TB = max(1, min(time_block, T))
    Tp = _round_up(T, TB)

    # Weight prep: gate-major zero-padding so gate k lives in columns
    # [k*Hp, (k+1)*Hp); padded rows/cols are zero so the math is unchanged.
    w_ih_g = jnp.zeros((4, Hp, I), jnp.float32).at[:, :H, :].set(
        w_ih.reshape(4, H, I))
    w_ih_t = jnp.transpose(w_ih_g, (2, 0, 1)).reshape(I, 4 * Hp)     # (I, 4Hp)
    w_hh_g = jnp.zeros((4, Hp, Hp), jnp.float32).at[:, :H, :H].set(
        w_hh.reshape(4, H, H))
    w_hh_t = jnp.transpose(w_hh_g, (2, 0, 1)).reshape(Hp, 4 * Hp)    # (Hp, 4Hp)
    b_all = jnp.zeros((4, Hp), jnp.float32).at[:, :H].set(
        (b_ih + b_hh).reshape(4, H)).reshape(1, 4 * Hp)              # (1, 4Hp)
    w_fc_p = jnp.zeros((Hp, Op), jnp.float32).at[:H, :O].set(w_fc.T)  # (Hp, Op)
    b_fc_p = jnp.zeros((1, Op), jnp.float32).at[0, :O].set(b_fc)      # (1, Op)

    # ---- phase 1: input projection for ALL timesteps (one big matmul) ----
    x_tbi = jnp.transpose(x.astype(jnp.float32), (1, 0, 2))          # (T, B, I)
    x_tbi = jnp.pad(x_tbi, ((0, Tp - T), (0, Bp - B), (0, 0)))       # (Tp,Bp,I)
    gx = _matmul_bias(x_tbi.reshape(Tp * Bp, I), w_ih_t, b_all)
    gx = gx.reshape(Tp, Bp, 4 * Hp)

    # ---- phase 2: sequential recurrence + fused fc (state in scratch) ----
    y = pl.pallas_call(
        _lstm_fused_kernel,
        out_shape=jax.ShapeDtypeStruct((Tp, Bp, Op), jnp.float32),
        grid_spec=pltpu.PrefetchScalarGridSpec(
            num_scalar_prefetch=0,
            grid=(Bp // B_BLK, Tp // TB),
            in_specs=[
                pl.BlockSpec((TB, B_BLK, 4 * Hp), lambda b, t: (t, b, 0)),
                pl.BlockSpec((Hp, 4 * Hp), lambda b, t: (0, 0)),
                pl.BlockSpec((Hp, Op), lambda b, t: (0, 0)),
                pl.BlockSpec((1, Op), lambda b, t: (0, 0)),
            ],
            out_specs=pl.BlockSpec((TB, B_BLK, Op), lambda b, t: (t, b, 0)),
            scratch_shapes=[
                pltpu.VMEM((B_BLK, Hp), jnp.float32),   # h state
                pltpu.VMEM((B_BLK, Hp), jnp.float32),   # c state
            ],
        ),
        compiler_params=pltpu.CompilerParams(
            dimension_semantics=("parallel", "arbitrary")),  # batch ∥, time seq
    )(gx, w_hh_t, w_fc_p, b_fc_p)

    return jnp.transpose(y, (1, 0, 2))[:B, :T, :O]                   # (B, T, O)


# --------------------------------------------------------------------------
# Pure-JAX reference (lax.scan) replicating torch.nn.LSTM + Linear.
# --------------------------------------------------------------------------
def _reference_forward(x, params):
    w_ih, w_hh, b_ih, b_hh, w_fc, b_fc = (
        params["w_ih"], params["w_hh"], params["b_ih"], params["b_hh"],
        params["w_fc"], params["b_fc"])
    H = w_hh.shape[1]
    B = x.shape[0]

    def step(carry, x_t):
        h, c = carry
        gates = x_t @ w_ih.T + h @ w_hh.T + b_ih + b_hh
        i = jax.nn.sigmoid(gates[:, 0 * H:1 * H])
        f = jax.nn.sigmoid(gates[:, 1 * H:2 * H])
        g = jnp.tanh(gates[:, 2 * H:3 * H])
        o = jax.nn.sigmoid(gates[:, 3 * H:4 * H])
        c = f * c + i * g
        h = o * jnp.tanh(c)
        return (h, c), h

    h0 = jnp.zeros((B, H), jnp.float32)
    c0 = jnp.zeros((B, H), jnp.float32)
    _, hs = jax.lax.scan(step, (h0, c0), jnp.transpose(x, (1, 0, 2)))
    out = hs @ w_fc.T + b_fc
    return jnp.transpose(out, (1, 0, 2))


def init_params(key, input_size, hidden_size, output_size):
    k = jax.random.split(key, 6)
    s = 1.0 / np.sqrt(hidden_size)
    return {
        "w_ih": jax.random.uniform(k[0], (4 * hidden_size, input_size), jnp.float32, -s, s),
        "w_hh": jax.random.uniform(k[1], (4 * hidden_size, hidden_size), jnp.float32, -s, s),
        "b_ih": jax.random.uniform(k[2], (4 * hidden_size,), jnp.float32, -s, s),
        "b_hh": jax.random.uniform(k[3], (4 * hidden_size,), jnp.float32, -s, s),
        "w_fc": jax.random.uniform(k[4], (output_size, hidden_size), jnp.float32, -s, s),
        "b_fc": jax.random.uniform(k[5], (output_size,), jnp.float32, -s, s),
    }


if __name__ == "__main__":
    B, T, I, H, O = 2, 8, 16, 32, 8
    key = jax.random.PRNGKey(0)
    kx, kp = jax.random.split(key)
    x = jax.random.normal(kx, (B, T, I), jnp.float32)
    params = init_params(kp, I, H, O)

    out = lstm_regressor_forward(x, params)
    out = jax.block_until_ready(out)

    ref = jax.block_until_ready(_reference_forward(x, params))
    np.testing.assert_allclose(np.asarray(out), np.asarray(ref), rtol=1e-5, atol=1e-5)

    print("KERNEL_OK")
</pallas_src>

<mosaic_0001>
module attributes {stable_mosaic.version = 11 : i64} {
  func.func @_matmul_bias_kernel(%arg0: i32, %arg1: memref<64x16xf32, #tpu.memory_space<vmem>>, %arg2: memref<16x512xf32, #tpu.memory_space<vmem>>, %arg3: memref<1x512xf32, #tpu.memory_space<vmem>>, %arg4: memref<64x512xf32, #tpu.memory_space<vmem>>) attributes {dimension_semantics = [#tpu.dimension_semantics<parallel>], iteration_bounds = array<i64: 1>, scalar_prefetch = 0 : i64, scratch_operands = 0 : i64, tpu.core_type = #tpu.core_type<tc>, window_params = [{transform_indices = @transform_0, window_bounds = array<i64: 64, 16>}, {pipeline_mode = #tpu.pipeline_mode<synchronous>, transform_indices = @transform_1, window_bounds = array<i64: 16, 512>}, {pipeline_mode = #tpu.pipeline_mode<synchronous>, transform_indices = @transform_2, window_bounds = array<i64: 1, 512>}, {transform_indices = @transform_3, window_bounds = array<i64: 64, 512>}]} {
    %c0 = arith.constant 0 : index
    %c0_0 = arith.constant 0 : index
    %0 = vector.load %arg1[%c0, %c0_0] : memref<64x16xf32, #tpu.memory_space<vmem>>, vector<64x16xf32>
    %c0_1 = arith.constant 0 : index
    %c0_2 = arith.constant 0 : index
    %1 = vector.load %arg2[%c0_1, %c0_2] : memref<16x512xf32, #tpu.memory_space<vmem>>, vector<16x512xf32>
    %cst = arith.constant dense<0.000000e+00> : vector<64x512xf32>
    %2 = tpu.matmul %0, %1, %cst {dimension_numbers = #tpu.dot_dimension_numbers<[1], [0], [0], [1], [0, 0, 1, 1], [], []>} : vector<64x16xf32>, vector<16x512xf32>, vector<64x512xf32> -> vector<64x512xf32>
    %c0_3 = arith.constant 0 : index
    %c0_4 = arith.constant 0 : index
    %3 = vector.load %arg3[%c0_3, %c0_4] : memref<1x512xf32, #tpu.memory_space<vmem>>, vector<1x512xf32>
    %4 = vector.broadcast %3 : vector<1x512xf32> to vector<64x512xf32>
    %5 = arith.addf %2, %4 : vector<64x512xf32>
    %c0_5 = arith.constant 0 : index
    %c0_6 = arith.constant 0 : index
    %6 = vector.load %arg4[%c0_5, %c0_6] : memref<64x512xf32, #tpu.memory_space<vmem>>, vector<64x512xf32>
    tpu.vector_store %arg4[%c0_5, %c0_6], %5 {strides = array<i32>} : memref<64x512xf32, #tpu.memory_space<vmem>>, vector<64x512xf32>,
    return
  }
  func.func @transform_0(%arg0: i32) -> (i32, i32) {
    %c0_i32 = arith.constant 0 : i32
    %c0_i32_0 = arith.constant 0 : i32
    return %arg0, %c0_i32 : i32, i32
  }
  func.func @transform_1(%arg0: i32) -> (i32, i32) {
    %c0_i32 = arith.constant 0 : i32
    %c0_i32_0 = arith.constant 0 : i32
    %c0_i32_1 = arith.constant 0 : i32
    return %c0_i32, %c0_i32_0 : i32, i32
  }
  func.func @transform_2(%arg0: i32) -> (i32, i32) {
    %c0_i32 = arith.constant 0 : i32
    %c0_i32_0 = arith.constant 0 : i32
    %c0_i32_1 = arith.constant 0 : i32
    return %c0_i32, %c0_i32_0 : i32, i32
  }
  func.func @transform_3(%arg0: i32) -> (i32, i32) {
    %c0_i32 = arith.constant 0 : i32
    %c0_i32_0 = arith.constant 0 : i32
    return %arg0, %c0_i32 : i32, i32
  }
}

</mosaic_0001>

<bundles_post_ra>
// kernel: tpu_custom_call.1
= control target key start
LH: loop header
LB: loop body
LE: loop exit
PB: predicated region body
PF: predicated region fallthrough
CT: control target
= control target key end

     0   :  { %v404_v7 = vmov 0.0   ;;  %vm53_vm0 = vcmask 130048   ;;  %s547_s0 = inlined_call_operand.vmem [shape: f32[64,16], index: 0, kind: input, shape index: {}]   ;;  %s548_s1 = inlined_call_operand.vmem [shape: f32[16,512], index: 1, kind: input, shape index: {}]   ;;  %s549_s2 = inlined_call_operand.vmem [shape: f32[1,512], index: 2, kind: input, shape index: {}]   ;;  %s550_s3 = inlined_call_operand.hbm [shape: f32[64,512], index: 3, kind: output, shape index: {}]  }
   0x1   :  { %v24_v0 = vld [vmem:[%s548_s1 + $0x8] sm:$0xff]  ;;  %v26_v2 = vld [vmem:[%s548_s1 + $0x18] sm:$0xff]  ;;  %v23_v5 = vld [vmem:[%s548_s1] sm:$0xff]  ;;  %142 = vmatprep.mubr.f32.mxu0 %v404_v7  ;;  %255 = vmatprep.mubr.f32.mxu1 %v404_v7 }
   0x2   :  { %v28_v1 = vld [vmem:[%s548_s1 + $0x28] sm:$0xff]  ;;  %v30_v4 = vld [vmem:[%s548_s1 + $0x38] sm:$0xff]  ;;  %v27_v6 = vld [vmem:[%s548_s1 + $0x20] sm:$0xff] }
   0x3   :  { %v368_v3 = vpack.c.bf16 %v28_v1, %v24_v0  ;;  %v372_v8 = vpack.c.bf16 %v30_v4, %v26_v2  ;;  %v370_v9 = vpack.c.bf16 %v27_v6, %v23_v5  ;;  %v25_v10 = vld [vmem:[%s548_s1 + $0x10] sm:$0xff]  ;;  %v15_v13 = vld [vmem:[%s547_s0] sm:$0xff] }
   0x4   :  { %v29_v11 = vld [vmem:[%s548_s1 + $0x30] sm:$0xff] }
   0x5   :  { %369 = vmatprep.subr.bf16.mxu0 %v368_v3  ;;  %v374_v12 = vpack.c.bf16 %v29_v11, %v25_v10  ;;  %373 = vmatprep.subr.bf16.mxu1 %v372_v8 }
   0x6   :  { %371 = vmatpush1.bf16.msra.mxu0 %v370_v9 }
   0x7   :  { %375 = vmatpush1.bf16.msra.mxu1 %v374_v12 }
   0x8   :  { %8 = vsyncpa [#allocation3], 0  ;;  %v16_v14 = vld [vmem:[%s547_s0 + $0x8] sm:$0xff]  ;;  %v17_v15 = vld [vmem:[%s547_s0 + $0x10] sm:$0xff]  ;;  %v33_v21 = vlaneseq }
   0x9   :  { %352 = vmatmul.mubr.msk.f32.vlgmr.msra.gmra.mrb[0].mxu0 %vm53_vm0, %v15_v13  ;;  %v18_v16 = vld [vmem:[%s547_s0 + $0x18] sm:$0xff]  ;;  %v19_v17 = vld [vmem:[%s547_s0 + $0x20] sm:$0xff]  ;;  %v20_v18 = vld [vmem:[%s547_s0 + $0x28] sm:$0xff] }
   0xa   :  { %360 = vmatmul.mubr.msk.f32.vlgmr.msra.gmra.mrb[0].mxu1 %vm53_vm0, %v15_v13  ;;  %148 = vmatprep.mubr.f32.mxu0 %v404_v7  ;;  %v21_v19 = vld [vmem:[%s547_s0 + $0x30] sm:$0xff]  ;;  %v22_v20 = vld [vmem:[%s547_s0 + $0x38] sm:$0xff]  ;;  %v34_v22 = vshrl.u32 %v33_v21, 7  ;;  %v31_v24 = vld [vmem:[%s549_s2] sm:$0xf]  ;;  %s405_s0 = smov [#allocation2]  }
   0xb   :  { %261 = vmatprep.mubr.f32.mxu1 %v404_v7  ;;  %s341_s2 = sshll.u32 %s405_s0, 4  ;;  %s342_s2 = int_to_ptr.vmem [resolvable:$true] %s341_s2 }
   0xc   :  { %v35_v23 = vsub.s32 0, %v34_v22  ;;  %v43_v25 = vsub.s32 2, %v34_v22  ;;  %v39_v26 = vsub.s32 1, %v34_v22  ;;  %v47_v27 = vsub.s32 3, %v34_v22  ;;  %s380_s18 = scalar_lea.vmem %s342_s2, 4096  ;;  %p385_p1 = scmp.lt.s32.totalorder %s342_s2, %s342_s2 }
   0xd   :  { %353 = vmatmul.mubr.msk.f32.gmra.mrb[2].mxu0 %vm53_vm0, %v16_v14  ;;  %p381_p0 = scmp.ne.s32.totalorder %s342_s2, %s380_s18  ;;  %p386_p2 = scmp.lt.s32.totalorder %s380_s18, %s380_s18 }
   0xe   :  { %361 = vmatmul.mubr.msk.f32.gmra.mrb[2].mxu1 %vm53_vm0, %v16_v14  ;;  %154 = vmatprep.mubr.f32.mxu0 %v404_v7  ;;  %v495_v28 = vrot.slane %v31_v24, %v35_v23  ;;  %v497_v29 = vrot.slane %v31_v24, %v43_v25  ;;  %v499_v30 = vrot.slane %v31_v24, %v39_v26 }
   0xf   :  { %267 = vmatprep.mubr.f32.mxu1 %v404_v7  ;;  %v501_v31 = vrot.slane %v31_v24, %v47_v27  ;;  %p387_p3 = por %p386_p2, %p385_p1 }
  0x11   :  { %354 = vmatmul.mubr.msk.f32.gmra.mrb[4].mxu0 %vm53_vm0, %v17_v15  ;;  %p388_p4 = pnand %p387_p3, %p381_p0 }
  0x12   :  { %362 = vmatmul.mubr.msk.f32.gmra.mrb[4].mxu1 %vm53_vm0, %v17_v15  ;;  %160 = vmatprep.mubr.f32.mxu0 %v404_v7 }
  0x13   :  { %273 = vmatprep.mubr.f32.mxu1 %v404_v7 }
  0x15   :  { %355 = vmatmul.mubr.msk.f32.gmra.mrb[6].mxu0 %vm53_vm0, %v18_v16 }
  0x16   :  { %363 = vmatmul.mubr.msk.f32.gmra.mrb[6].mxu1 %vm53_vm0, %v18_v16  ;;  %166 = vmatprep.mubr.f32.mxu0 %v404_v7 }
  0x17   :  { %279 = vmatprep.mubr.f32.mxu1 %v404_v7 }
  0x19   :  { %356 = vmatmul.mubr.msk.f32.gmra.mrb[8].mxu0 %vm53_vm0, %v19_v17 }
  0x1a   :  { %364 = vmatmul.mubr.msk.f32.gmra.mrb[8].mxu1 %vm53_vm0, %v19_v17  ;;  %172 = vmatprep.mubr.f32.mxu0 %v404_v7 }
  0x1b   :  { %285 = vmatprep.mubr.f32.mxu1 %v404_v7 }
  0x1d   :  { %357 = vmatmul.mubr.msk.f32.gmra.mrb[10].mxu0 %vm53_vm0, %v20_v18 }
  0x1e   :  { %365 = vmatmul.mubr.msk.f32.gmra.mrb[10].mxu1 %vm53_vm0, %v20_v18  ;;  %178 = vmatprep.mubr.f32.mxu0 %v404_v7 }
  0x1f   :  { %291 = vmatprep.mubr.f32.mxu1 %v404_v7 }
  0x21   :  { %358 = vmatmul.mubr.msk.f32.gmra.mrb[12].mxu0 %vm53_vm0, %v21_v19 }
  0x22   :  { %366 = vmatmul.mubr.msk.f32.gmra.mrb[12].mxu1 %vm53_vm0, %v21_v19  ;;  %184 = vmatprep.mubr.f32.mxu0 %v404_v7 }
  0x23   :  { %297 = vmatprep.mubr.f32.mxu1 %v404_v7 }
  0x25   :  { %359 = vmatmul.mubr.msk.f32.gmra.mrb[14].mxu0 %vm53_vm0, %v22_v20 }
  0x26   :  { %367 = vmatmul.mubr.msk.f32.gmra.mrb[14].mxu1 %vm53_vm0, %v22_v20 }
  0xdc   :  { %v144_v32 = vpop.f32.mrb[0].mxu0 }
  0xdd   :  { %v145_v33 = vadd.f32 %v144_v32, %v495_v28  ;;  %v257_v34 = vpop.f32.mrb[0].mxu1  ;;  %v146_v35 = vpop.f32.mrb[1].mxu0 }
  0xde   :  { %v258_v36 = vadd.f32 %v257_v34, %v497_v29  ;;  %v147_v37 = vadd.f32 %v146_v35, %v499_v30  ;;  %v259_v38 = vpop.f32.mrb[1].mxu1 }
  0xdf   :  { %304 = vst [vmem:[#allocation2] sm:$0xff] %v145_v33  ;;  %v260_v39 = vadd.f32 %v259_v38, %v501_v31 }
  0xe0   :  { %306 = vst [vmem:[#allocation2 + $0x10] sm:$0xff] %v258_v36  ;;  %305 = vst [vmem:[#allocation2 + $0x8] sm:$0xff] %v147_v37  ;;  %v150_v40 = vpop.f32.mrb[2].mxu0 }
  0xe1   :  { %307 = vst [vmem:[#allocation2 + $0x18] sm:$0xff] %v260_v39  ;;  %v151_v41 = vadd.f32 %v150_v40, %v495_v28  ;;  %v263_v42 = vpop.f32.mrb[2].mxu1  ;;  %v152_v43 = vpop.f32.mrb[3].mxu0 }
  0xe2   :  { %v264_v44 = vadd.f32 %v263_v42, %v497_v29  ;;  %v153_v45 = vadd.f32 %v152_v43, %v499_v30  ;;  %v265_v46 = vpop.f32.mrb[3].mxu1 }
  0xe3   :  { %308 = vst [vmem:[#allocation2 + $0x20] sm:$0xff] %v151_v41  ;;  %v266_v47 = vadd.f32 %v265_v46, %v501_v31 }
  0xe4   :  { %310 = vst [vmem:[#allocation2 + $0x30] sm:$0xff] %v264_v44  ;;  %309 = vst [vmem:[#allocation2 + $0x28] sm:$0xff] %v153_v45  ;;  %v156_v48 = vpop.f32.mrb[4].mxu0 }
  0xe5   :  { %311 = vst [vmem:[#allocation2 + $0x38] sm:$0xff] %v266_v47  ;;  %v157_v49 = vadd.f32 %v156_v48, %v495_v28  ;;  %v269_v50 = vpop.f32.mrb[4].mxu1  ;;  %v158_v51 = vpop.f32.mrb[5].mxu0 }
  0xe6   :  { %v270_v52 = vadd.f32 %v269_v50, %v497_v29  ;;  %v159_v53 = vadd.f32 %v158_v51, %v499_v30  ;;  %v271_v54 = vpop.f32.mrb[5].mxu1 }
  0xe7   :  { %312 = vst [vmem:[#allocation2 + $0x40] sm:$0xff] %v157_v49  ;;  %v272_v55 = vadd.f32 %v271_v54, %v501_v31 }
  0xe8   :  { %314 = vst [vmem:[#allocation2 + $0x50] sm:$0xff] %v270_v52  ;;  %313 = vst [vmem:[#allocation2 + $0x48] sm:$0xff] %v159_v53  ;;  %v162_v56 = vpop.f32.mrb[6].mxu0 }
  0xe9   :  { %315 = vst [vmem:[#allocation2 + $0x58] sm:$0xff] %v272_v55  ;;  %v163_v57 = vadd.f32 %v162_v56, %v495_v28  ;;  %v275_v58 = vpop.f32.mrb[6].mxu1  ;;  %v164_v59 = vpop.f32.mrb[7].mxu0 }
  0xea   :  { %v276_v60 = vadd.f32 %v275_v58, %v497_v29  ;;  %v165_v61 = vadd.f32 %v164_v59, %v499_v30  ;;  %v277_v62 = vpop.f32.mrb[7].mxu1 }
  0xeb   :  { %316 = vst [vmem:[#allocation2 + $0x60] sm:$0xff] %v163_v57  ;;  %v278_v63 = vadd.f32 %v277_v62, %v501_v31 }
  0xec   :  { %318 = vst [vmem:[#allocation2 + $0x70] sm:$0xff] %v276_v60  ;;  %317 = vst [vmem:[#allocation2 + $0x68] sm:$0xff] %v165_v61  ;;  %v168_v0 = vpop.f32.mrb[8].mxu0 }
  0xed   :  { %319 = vst [vmem:[#allocation2 + $0x78] sm:$0xff] %v278_v63  ;;  %v169_v1 = vadd.f32 %v168_v0, %v495_v28  ;;  %v281_v2 = vpop.f32.mrb[8].mxu1  ;;  %v170_v3 = vpop.f32.mrb[9].mxu0 }
  0xee   :  { %v282_v4 = vadd.f32 %v281_v2, %v497_v29  ;;  %v171_v5 = vadd.f32 %v170_v3, %v499_v30  ;;  %v283_v6 = vpop.f32.mrb[9].mxu1 }
  0xef   :  { %320 = vst [vmem:[#allocation2 + $0x80] sm:$0xff] %v169_v1  ;;  %v284_v7 = vadd.f32 %v283_v6, %v501_v31 }
  0xf0   :  { %322 = vst [vmem:[#allocation2 + $0x90] sm:$0xff] %v282_v4  ;;  %321 = vst [vmem:[#allocation2 + $0x88] sm:$0xff] %v171_v5  ;;  %v174_v8 = vpop.f32.mrb[10].mxu0 }
  0xf1   :  { %323 = vst [vmem:[#allocation2 + $0x98] sm:$0xff] %v284_v7  ;;  %v175_v9 = vadd.f32 %v174_v8, %v495_v28  ;;  %v287_v10 = vpop.f32.mrb[10].mxu1  ;;  %v176_v11 = vpop.f32.mrb[11].mxu0 }
  0xf2   :  { %v288_v12 = vadd.f32 %v287_v10, %v497_v29  ;;  %v177_v13 = vadd.f32 %v176_v11, %v499_v30  ;;  %v289_v14 = vpop.f32.mrb[11].mxu1 }
  0xf3   :  { %324 = vst [vmem:[#allocation2 + $0xa0] sm:$0xff] %v175_v9  ;;  %v290_v15 = vadd.f32 %v289_v14, %v501_v31 }
  0xf4   :  { %326 = vst [vmem:[#allocation2 + $0xb0] sm:$0xff] %v288_v12  ;;  %325 = vst [vmem:[#allocation2 + $0xa8] sm:$0xff] %v177_v13  ;;  %v180_v16 = vpop.f32.mrb[12].mxu0 }
  0xf5   :  { %327 = vst [vmem:[#allocation2 + $0xb8] sm:$0xff] %v290_v15  ;;  %v181_v17 = vadd.f32 %v180_v16, %v495_v28  ;;  %v293_v18 = vpop.f32.mrb[12].mxu1  ;;  %v182_v19 = vpop.f32.mrb[13].mxu0 }
  0xf6   :  { %v294_v20 = vadd.f32 %v293_v18, %v497_v29  ;;  %v183_v21 = vadd.f32 %v182_v19, %v499_v30  ;;  %v295_v22 = vpop.f32.mrb[13].mxu1 }
  0xf7   :  { %328 = vst [vmem:[#allocation2 + $0xc0] sm:$0xff] %v181_v17  ;;  %v296_v23 = vadd.f32 %v295_v22, %v501_v31 }
  0xf8   :  { %330 = vst [vmem:[#allocation2 + $0xd0] sm:$0xff] %v294_v20  ;;  %329 = vst [vmem:[#allocation2 + $0xc8] sm:$0xff] %v183_v21  ;;  %v186_v24 = vpop.f32.mrb[14].mxu0 }
  0xf9   :  { %331 = vst [vmem:[#allocation2 + $0xd8] sm:$0xff] %v296_v23  ;;  %v187_v25 = vadd.f32 %v186_v24, %v495_v28  ;;  %v299_v26 = vpop.f32.mrb[14].mxu1  ;;  %v188_v27 = vpop.f32.mrb[15].mxu0 }
  0xfa   :  { %v300_v32 = vadd.f32 %v299_v26, %v497_v29  ;;  %v189_v33 = vadd.f32 %v188_v27, %v499_v30  ;;  %v301_v34 = vpop.f32.mrb[15].mxu1 }
  0xfb   :  { %332 = vst [vmem:[#allocation2 + $0xe0] sm:$0xff] %v187_v25  ;;  %v302_v35 = vadd.f32 %v301_v34, %v501_v31 }
  0xfc   :  { %334 = vst [vmem:[#allocation2 + $0xf0] sm:$0xff] %v300_v32  ;;  %333 = vst [vmem:[#allocation2 + $0xe8] sm:$0xff] %v189_v33 }
  0xfd   :  { %335 = vst [vmem:[#allocation2 + $0xf8] sm:$0xff] %v302_v35 }
  0xfe   :  { %391 = shalt.err (!%p388_p4)
}
  0xff   :  { %s392_s21 = scalar_lea.hbm %s550_s3, 4096 }
 0x100   :  { %p393_p5 = scmp.ne.s32.totalorder %s550_s3, %s392_s21  ;;  %p396_p6 = scmp.lt.u32.totalorder %s392_s21, %s550_s3 }
 0x102   :  { %p398_p7 = pnand %p396_p6, %p393_p5 }
 0x104   :  { %401 = shalt.err (!%p398_p7)
}
 0x105   :  { %s406_s26 = smov 512   ;;  %s407_s27 = smov 32  }
 0x106   :  { %347 = dma.vmem_to_hbm [thread:$0]  %s342_s2, 4096, %s550_s3, [#allocation3], %s406_s26, %s406_s26, %s407_s27  }
 0x107   :  { %402 = dma.done.wait [#allocation3], 4096  }
 0x108   :  { %403 = vsyncadd [#allocation3], 4294963200 }
 0x109   :  { %351 = vsyncpa [#allocation3], 1 }

</bundles_post_ra>
